<compile_context>
chip_gen: v6e
topology: v6e:2x2x1
jax: 0.10.0
libtpu: 0.0.40
codegen_flags: <defaults>
</compile_context>

<pallas_src>
import functools

import numpy as np
import jax
import jax.numpy as jnp
from jax import lax
from jax.experimental import pallas as pl
from jax.experimental.pallas import tpu as pltpu

# torch.finfo(torch.float32).eps == np.finfo(np.float32).eps == 1.1920929e-07
EPS = float(np.finfo(np.float32).eps)


def _sigmoid(x):
    # tanh form: one EUP op per element instead of exp + divide.
    # TODO(synk): on v6e/v7x, bf16 inputs + bf16 tanh would halve DMA bytes and EUP
    # cost at scale (keep f32 on v5e: no bf16 VPU/EUP there).
    return 0.5 * (jnp.tanh(0.5 * x) + 1.0)


def _unlearn_kernel(sigmoid, n_targets, n_agents, t_blk,
                    it_ref, tt_ref, iz_ref, tz_ref,
                    xt_ref, tta_ref, ta_ref, out_ref):
    """One grid step = one block of `t_blk` targets.

    Writes a lane-dense (1, 8, 128) block holding
        sum_{t in block} (loss_reg2_t + loss_reg1_t) / n_targets
    (broadcast across the block), plus -- on block 0 only -- the two reconstruction
    MSE sums.  The wrapper reads element [b, 0, 0] of every block and sums.
    """
    f32 = jnp.float32
    blk = pl.program_id(0)
    base = blk * t_blk

    # Resident per-agent matrix input_t[0] (constant-index block, DMA'd once).
    x_t = xt_ref[...].astype(f32)                                    # (A, D)
    if sigmoid:
        x_t = _sigmoid(x_t)
    n_all = jnp.sum(x_t * x_t, axis=-1, keepdims=True)               # (A, 1)
    agent_col = lax.broadcasted_iota(jnp.int32, (n_agents, 1), 0)    # (A, 1)
    inv_eps = 1.0 / EPS

    def per_target(t, acc):
        g = base + t                                # global target index
        gi = jnp.minimum(g, n_targets - 1)          # clamped -> safe loads in last block

        # ---- loss_reg2(input_theta_tilde_agent[:, g], target_theta_agent[:, g]) ----
        # batch == 1:  MSE_sum(cos * x_tgt, x_tgt) == (cos - 1)^2 * ||x_tgt||^2
        x_list = tta_ref[t].astype(f32)                              # (A, D)
        x_tgt2 = ta_ref[pl.ds(t, 1), :].astype(f32)                  # (1, D)
        if sigmoid:
            x_list = _sigmoid(x_list)
            x_tgt2 = _sigmoid(x_tgt2)
        # TODO(synk): for very large D these lane reductions would want D-chunking.
        dots2 = jnp.sum(x_list * x_tgt2, axis=-1, keepdims=True)     # (A, 1) VPU matvec
        n_lst2 = jnp.sum(x_list * x_list, axis=-1, keepdims=True)    # (A, 1)
        n_tgt2 = jnp.sum(x_tgt2 * x_tgt2)                            # scalar
        cos2 = dots2 * jnp.minimum(lax.rsqrt(n_tgt2 * n_lst2), inv_eps)
        reg2 = (-1.0 / n_agents) * n_tgt2 * jnp.sum((cos2 - 1.0) ** 2)

        # ---- loss_reg1(input_t, target_id=g): agents != g ---------------------------
        # TODO(synk): when min(T, A) >= 64 (>=128 on v5e) a single MXU gram of
        # x_t[:T] @ x_t.T would beat this per-target VPU matvec.
        x_tgt1 = xt_ref[pl.ds(gi, 1), :].astype(f32)                 # (1, D)
        if sigmoid:
            x_tgt1 = _sigmoid(x_tgt1)
        dots1 = jnp.sum(x_t * x_tgt1, axis=-1, keepdims=True)        # (A, 1)
        n_tgt1 = jnp.sum(x_tgt1 * x_tgt1)                            # scalar
        cos1 = dots1 * jnp.minimum(lax.rsqrt(n_tgt1 * n_all), inv_eps)
        per_pair = jnp.where(agent_col == gi, 0.0, (cos1 - 1.0) ** 2)
        reg1 = (-1.0 / (n_agents - 1)) * n_tgt1 * jnp.sum(per_pair)

        # Mask out padded targets of the (possibly partial) last block.
        return acc + jnp.where(g < n_targets, reg2 + reg1, 0.0)

    reg_sum = lax.fori_loop(0, t_blk, per_target, jnp.float32(0.0))
    out_ref[...] = jnp.full((1, 8, 128), reg_sum * (1.0 / n_targets), dtype=f32)

    # Reconstruction losses: F.mse_loss(reduction='sum') on both pairs, block 0 only.
    @pl.when(blk == 0)
    def _():
        def mse_sum(a_ref, b_ref):
            a = a_ref[...].astype(f32)
            b = b_ref[...].astype(f32)
            if sigmoid:
                a = _sigmoid(a)
                b = _sigmoid(b)
            d = a - b
            return jnp.sum(d * d)

        rec = mse_sum(it_ref, tt_ref) + mse_sum(iz_ref, tz_ref)
        out_ref[...] = out_ref[...] + rec

    # TODO(synk): the original module also appends rec/reg/angle statistics to a log
    # file on disk; that side effect and the angle-only values are omitted here.


def _lane_dense(x):
    """Layout-only reshape so the rec operands map densely onto the 128 lanes."""
    n = int(x.size)
    if n % 128 == 0:
        return x.reshape(n // 128, 128)
    if x.ndim == 1:
        return x.reshape(1, -1)
    return x.reshape(-1, x.shape[-1])


def _pick_target_block(n_targets, n_agents, d, itemsize):
    tile_budget = 4 << 20                        # one x_tta tile; doubled by pipelining
    t_blk = max(1, tile_budget // max(1, n_agents * d * itemsize))
    if t_blk < n_targets:
        t_blk = max(8, (t_blk // 8) * 8)         # keep the (T_blk, D) block sublane-aligned
    if t_blk >= n_targets:
        t_blk = n_targets
    return int(t_blk)


def unlearn_loss_unnorm(input_theta, target_theta, input_z, target_z,
                        input_t, input_theta_tilde_agent, target_theta_agent,
                        *, sigmoid=False):
    """JAX/Pallas equivalent of UnlearnLossUnnorm(sigmoid).forward(...)."""
    assert input_theta.shape == target_theta.shape, "rec pair shapes must match"
    assert input_z.shape == target_z.shape, "rec pair shapes must match"
    assert input_t.shape[0] == 1, "module semantics require batch == 1 (uses .item())"
    assert input_theta_tilde_agent.shape[0] == 1 and target_theta_agent.shape[0] == 1

    x_t = input_t[0]                              # (A, D)   leading size-1 slice is free
    x_tta = input_theta_tilde_agent[0]            # (T, A, D)
    x_ta = target_theta_agent[0]                  # (T, D)
    T, A, D = x_tta.shape
    assert x_ta.shape == (T, D) and x_t.shape == (A, D)
    assert A > 1, "loss_reg1 divides by (A - 1)"
    assert T <= A, "loss_reg1 indexes target ids into the agent axis (needs T <= A)"

    it, tt = _lane_dense(input_theta), _lane_dense(target_theta)
    iz, tz = _lane_dense(input_z), _lane_dense(target_z)

    t_blk = _pick_target_block(T, A, D, x_tta.dtype.itemsize)
    nb = -(-T // t_blk)

    rec_bytes = sum(int(a.size) * a.dtype.itemsize for a in (it, tt, iz, tz))
    fixed_bytes = A * D * x_t.dtype.itemsize + rec_bytes
    tile_bytes = t_blk * (A + 1) * D * x_tta.dtype.itemsize       # tta + ta tile
    vmem_limit = int(min(64 << 20, max(32 << 20, 4 * (fixed_bytes + 2 * tile_bytes))))

    rec_elems = int(it.size) + int(iz.size)
    flops = int(6 * T * A * D + 2 * A * D + 6 * rec_elems)
    transcendentals = int(2 * T * A
                          + ((T * A * D + T * D + A * D + 2 * rec_elems) if sigmoid else 0))
    bytes_accessed = int(x_tta.size * x_tta.dtype.itemsize
                         + x_ta.size * x_ta.dtype.itemsize
                         + A * D * x_t.dtype.itemsize
                         + rec_bytes + nb * 8 * 128 * 4)

    kernel = functools.partial(_unlearn_kernel, sigmoid, T, A, t_blk)
    out = pl.pallas_call(
        kernel,
        out_shape=jax.ShapeDtypeStruct((nb, 8, 128), jnp.float32),
        grid=(nb,),
        in_specs=[
            pl.BlockSpec(it.shape, lambda b: (0, 0)),
            pl.BlockSpec(tt.shape, lambda b: (0, 0)),
            pl.BlockSpec(iz.shape, lambda b: (0, 0)),
            pl.BlockSpec(tz.shape, lambda b: (0, 0)),
            pl.BlockSpec((A, D), lambda b: (0, 0)),
            pl.BlockSpec((t_blk, A, D), lambda b: (b, 0, 0)),   # pipelined over targets
            pl.BlockSpec((t_blk, D), lambda b: (b, 0)),
        ],
        out_specs=pl.BlockSpec((1, 8, 128), lambda b: (b, 0, 0)),
        compiler_params=pltpu.CompilerParams(
            dimension_semantics=("parallel",),
            vmem_limit_bytes=vmem_limit,
        ),
        cost_estimate=pl.CostEstimate(
            flops=flops, transcendentals=transcendentals, bytes_accessed=bytes_accessed),
    )(it, tt, iz, tz, x_t, x_tta, x_ta)

    # One partial per target block (element [b, 0, 0]); sum gives
    # rec + (reg_theta + reg_t) / n_targets.
    return jnp.sum(out[:, 0, 0])


# ----------------------------- pure-JAX reference -------------------------------------
def _ref_loss(input_theta, target_theta, input_z, target_z,
              input_t, itta, tta, sigmoid=False):
    if sigmoid:
        sg = jax.nn.sigmoid
        input_theta, target_theta = sg(input_theta), sg(target_theta)
        input_z, target_z = sg(input_z), sg(target_z)
        input_t, itta, tta = sg(input_t), sg(itta), sg(tta)

    def mse_sum(a, b):
        return jnp.sum((a - b) ** 2)

    def cos(a, b):  # cosine similarity along dim=1, torch-style eps clamp
        w12 = jnp.sum(a * b, axis=1)
        w1 = jnp.sum(a * a, axis=1)
        w2 = jnp.sum(b * b, axis=1)
        return w12 / jnp.maximum(jnp.sqrt(w1 * w2), EPS)

    rec = mse_sum(input_theta, target_theta) + mse_sum(input_z, target_z)
    T = tta.shape[1]

    reg_theta = 0.0
    for t in range(T):                       # loss_reg2 per target
        x_list, x_tgt = itta[:, t], tta[:, t]
        A = x_list.shape[1]
        s = 0.0
        for i in range(A):
            c = cos(x_tgt, x_list[:, i])
            s += mse_sum(c.reshape(-1, 1) * x_tgt, x_tgt)
        reg_theta += -s / A

    A = input_t.shape[1]
    reg_t = 0.0
    for t in range(T):                       # loss_reg1 per target_id
        x_tgt = input_t[:, t]
        s = 0.0
        for i in range(A):
            if i == t:
                continue
            c = cos(x_tgt, input_t[:, i])
            s += mse_sum(c * x_tgt, x_tgt)   # batch==1: broadcast matches torch
        reg_t += -s / (A - 1)

    return rec + (reg_theta + reg_t) / T


if __name__ == "__main__":
    key = jax.random.PRNGKey(0)
    ks = jax.random.split(key, 7)

    B, T, A, D, R = 1, 3, 4, 32, 4   # batch, n_targets, n_agents, hidden, theta rows
    input_theta = jax.random.normal(ks[0], (R, D), jnp.float32)
    target_theta = jax.random.normal(ks[1], (R, D), jnp.float32)
    input_z = jax.random.normal(ks[2], (R, D), jnp.float32)
    target_z = jax.random.normal(ks[3], (R, D), jnp.float32)
    input_t = jax.random.normal(ks[4], (B, A, D), jnp.float32)
    input_theta_tilde_agent = jax.random.normal(ks[5], (B, T, A, D), jnp.float32)
    target_theta_agent = jax.random.normal(ks[6], (B, T, D), jnp.float32)

    for sig in (False, True):
        out = unlearn_loss_unnorm(input_theta, target_theta, input_z, target_z,
                                  input_t, input_theta_tilde_agent, target_theta_agent,
                                  sigmoid=sig)
        out = jax.block_until_ready(out)
        ref = _ref_loss(input_theta, target_theta, input_z, target_z,
                        input_t, input_theta_tilde_agent, target_theta_agent,
                        sigmoid=sig)
        np.testing.assert_allclose(np.asarray(out), np.asarray(ref),
                                   rtol=1e-4, atol=1e-3)
    print("KERNEL_OK")
</pallas_src>

<mosaic_0001>
module attributes {stable_mosaic.version = 11 : i64} {
  func.func @_unlearn_kernel(%arg0: i32, %arg1: memref<1x128xf32, #tpu.memory_space<vmem>>, %arg2: memref<1x128xf32, #tpu.memory_space<vmem>>, %arg3: memref<1x128xf32, #tpu.memory_space<vmem>>, %arg4: memref<1x128xf32, #tpu.memory_space<vmem>>, %arg5: memref<4x32xf32, #tpu.memory_space<vmem>>, %arg6: memref<3x4x32xf32, #tpu.memory_space<vmem>>, %arg7: memref<3x32xf32, #tpu.memory_space<vmem>>, %arg8: memref<1x8x128xf32, #tpu.memory_space<vmem>>) attributes {dimension_semantics = [#tpu.dimension_semantics<parallel>], iteration_bounds = array<i64: 1>, scalar_prefetch = 0 : i64, scratch_operands = 0 : i64, tpu.core_type = #tpu.core_type<tc>, window_params = [{pipeline_mode = #tpu.pipeline_mode<synchronous>, transform_indices = @transform_0, window_bounds = array<i64: 1, 128>}, {pipeline_mode = #tpu.pipeline_mode<synchronous>, transform_indices = @transform_1, window_bounds = array<i64: 1, 128>}, {pipeline_mode = #tpu.pipeline_mode<synchronous>, transform_indices = @transform_2, window_bounds = array<i64: 1, 128>}, {pipeline_mode = #tpu.pipeline_mode<synchronous>, transform_indices = @transform_3, window_bounds = array<i64: 1, 128>}, {pipeline_mode = #tpu.pipeline_mode<synchronous>, transform_indices = @transform_4, window_bounds = array<i64: 4, 32>}, {transform_indices = @transform_5, window_bounds = array<i64: 3, 4, 32>}, {transform_indices = @transform_6, window_bounds = array<i64: 3, 32>}, {transform_indices = @transform_7, window_bounds = array<i64: 1, 8, 128>}]} {
    %c3_i32 = arith.constant 3 : i32
    %0 = arith.muli %arg0, %c3_i32 : i32
    %c0 = arith.constant 0 : index
    %c0_0 = arith.constant 0 : index
    %1 = vector.load %arg5[%c0, %c0_0] : memref<4x32xf32, #tpu.memory_space<vmem>>, vector<4x32xf32>
    %2 = arith.mulf %1, %1 : vector<4x32xf32>
    %cst = arith.constant dense<0.000000e+00> : vector<4xf32>
    %3 = vector.multi_reduction <add>, %2, %cst [1] : vector<4x32xf32> to vector<4xf32>
    %4 = vector.shape_cast %3 : vector<4xf32> to vector<4x1xf32>
    %5 = tpu.iota {dimensions = array<i32: 0>} : vector<4x1xi32>
    %cst_1 = arith.constant 0.000000e+00 : f32
    %c0_i32 = arith.constant 0 : i32
    %c3_i32_2 = arith.constant 3 : i32
    %6 = arith.addi %c0_i32, %c3_i32_2 : i32
    %c1_i32 = arith.constant 1 : i32
    %7 = scf.for %arg9 = %c0_i32 to %6 step %c1_i32 iter_args(%arg10 = %cst_1) -> (f32)  : i32 {
      %14 = arith.addi %0, %arg9 : i32
      %c2_i32 = arith.constant 2 : i32
      %15 = arith.minsi %14, %c2_i32 : i32
      %16 = arith.index_cast %arg9 : i32 to index
      %c0_10 = arith.constant 0 : index
      %c0_11 = arith.constant 0 : index
      %17 = vector.load %arg6[%16, %c0_10, %c0_11] : memref<3x4x32xf32, #tpu.memory_space<vmem>>, vector<1x4x32xf32>
      %18 = vector.shape_cast %17 : vector<1x4x32xf32> to vector<4x32xf32>
      %19 = arith.index_cast %arg9 : i32 to index
      %c0_12 = arith.constant 0 : index
      %20 = vector.load %arg7[%19, %c0_12] : memref<3x32xf32, #tpu.memory_space<vmem>>, vector<1x32xf32>
      %21 = vector.broadcast %20 : vector<1x32xf32> to vector<4x32xf32>
      %22 = arith.mulf %18, %21 : vector<4x32xf32>
      %cst_13 = arith.constant dense<0.000000e+00> : vector<4xf32>
      %23 = vector.multi_reduction <add>, %22, %cst_13 [1] : vector<4x32xf32> to vector<4xf32>
      %24 = vector.shape_cast %23 : vector<4xf32> to vector<4x1xf32>
      %25 = arith.mulf %18, %18 : vector<4x32xf32>
      %cst_14 = arith.constant dense<0.000000e+00> : vector<4xf32>
      %26 = vector.multi_reduction <add>, %25, %cst_14 [1] : vector<4x32xf32> to vector<4xf32>
      %27 = vector.shape_cast %26 : vector<4xf32> to vector<4x1xf32>
      %28 = arith.mulf %20, %20 : vector<1x32xf32>
      %29 = vector.shape_cast %28 : vector<1x32xf32> to vector<1x1x32xf32>
      %cst_15 = arith.constant dense<0.000000e+00> : vector<1xf32>
      %30 = vector.multi_reduction <add>, %29, %cst_15 [1, 2] : vector<1x1x32xf32> to vector<1xf32>
      %31 = vector.shape_cast %30 : vector<1xf32> to vector<1x1x1xf32>
      %32 = vector.extract %31[0, 0, 0] : f32 from vector<1x1x1xf32>
      %33 = vector.broadcast %32 : f32 to vector<4x1xf32>
      %34 = arith.mulf %33, %27 : vector<4x1xf32>
      %35 = math.rsqrt %34 : vector<4x1xf32>
      %cst_16 = arith.constant 0x4B000000 : f32
      %36 = vector.broadcast %cst_16 : f32 to vector<4x1xf32>
      %37 = arith.minimumf %35, %36 : vector<4x1xf32>
      %38 = arith.mulf %24, %37 : vector<4x1xf32>
      %cst_17 = arith.constant -2.500000e-01 : f32
      %39 = arith.mulf %cst_17, %32 : f32
      %cst_18 = arith.constant 1.000000e+00 : f32
      %40 = vector.broadcast %cst_18 : f32 to vector<4x1xf32>
      %41 = arith.subf %38, %40 : vector<4x1xf32>
      %42 = arith.mulf %41, %41 : vector<4x1xf32>
      %43 = vector.shape_cast %42 : vector<4x1xf32> to vector<1x4x1xf32>
      %cst_19 = arith.constant dense<0.000000e+00> : vector<1xf32>
      %44 = vector.multi_reduction <add>, %43, %cst_19 [1, 2] : vector<1x4x1xf32> to vector<1xf32>
      %45 = vector.shape_cast %44 : vector<1xf32> to vector<1x1x1xf32>
      %46 = vector.extract %45[0, 0, 0] : f32 from vector<1x1x1xf32>
      %47 = arith.mulf %39, %46 : f32
      %48 = arith.index_cast %15 : i32 to index
      %c0_20 = arith.constant 0 : index
      %49 = vector.load %arg5[%48, %c0_20] : memref<4x32xf32, #tpu.memory_space<vmem>>, vector<1x32xf32>
      %50 = vector.broadcast %49 : vector<1x32xf32> to vector<4x32xf32>
      %51 = arith.mulf %1, %50 : vector<4x32xf32>
      %cst_21 = arith.constant dense<0.000000e+00> : vector<4xf32>
      %52 = vector.multi_reduction <add>, %51, %cst_21 [1] : vector<4x32xf32> to vector<4xf32>
      %53 = vector.shape_cast %52 : vector<4xf32> to vector<4x1xf32>
      %54 = arith.mulf %49, %49 : vector<1x32xf32>
      %55 = vector.shape_cast %54 : vector<1x32xf32> to vector<1x1x32xf32>
      %cst_22 = arith.constant dense<0.000000e+00> : vector<1xf32>
      %56 = vector.multi_reduction <add>, %55, %cst_22 [1, 2] : vector<1x1x32xf32> to vector<1xf32>
      %57 = vector.shape_cast %56 : vector<1xf32> to vector<1x1x1xf32>
      %58 = vector.extract %57[0, 0, 0] : f32 from vector<1x1x1xf32>
      %59 = vector.broadcast %58 : f32 to vector<4x1xf32>
      %60 = arith.mulf %59, %4 : vector<4x1xf32>
      %61 = math.rsqrt %60 : vector<4x1xf32>
      %cst_23 = arith.constant 0x4B000000 : f32
      %62 = vector.broadcast %cst_23 : f32 to vector<4x1xf32>
      %63 = arith.minimumf %61, %62 : vector<4x1xf32>
      %64 = arith.mulf %53, %63 : vector<4x1xf32>
      %65 = vector.broadcast %15 : i32 to vector<4x1xi32>
      %66 = arith.cmpi eq, %5, %65 : vector<4x1xi32>
      %cst_24 = arith.constant 1.000000e+00 : f32
      %67 = vector.broadcast %cst_24 : f32 to vector<4x1xf32>
      %68 = arith.subf %64, %67 : vector<4x1xf32>
      %69 = arith.mulf %68, %68 : vector<4x1xf32>
      %cst_25 = arith.constant 0.000000e+00 : f32
      %70 = vector.broadcast %cst_25 : f32 to vector<4x1xf32>
      %71 = arith.select %66, %70, %69 : vector<4x1xi1>, vector<4x1xf32>
      %cst_26 = arith.constant -0.333333343 : f32
      %72 = arith.mulf %cst_26, %58 : f32
      %73 = vector.shape_cast %71 : vector<4x1xf32> to vector<1x4x1xf32>
      %cst_27 = arith.constant dense<0.000000e+00> : vector<1xf32>
      %74 = vector.multi_reduction <add>, %73, %cst_27 [1, 2] : vector<1x4x1xf32> to vector<1xf32>
      %75 = vector.shape_cast %74 : vector<1xf32> to vector<1x1x1xf32>
      %76 = vector.extract %75[0, 0, 0] : f32 from vector<1x1x1xf32>
      %77 = arith.mulf %72, %76 : f32
      %c3_i32_28 = arith.constant 3 : i32
      %78 = arith.cmpi slt, %14, %c3_i32_28 : i32
      %79 = arith.addf %47, %77 : f32
      %cst_29 = arith.constant 0.000000e+00 : f32
      %80 = arith.select %78, %79, %cst_29 : f32
      %81 = arith.addf %arg10, %80 : f32
      scf.yield %81 : f32
    }
    %c3_i32_3 = arith.constant 3 : i32
    %cst_4 = arith.constant 0.333333343 : f32
    %8 = arith.mulf %7, %cst_4 : f32
    %9 = vector.broadcast %8 : f32 to vector<1x8x128xf32>
    %c0_5 = arith.constant 0 : index
    %c0_6 = arith.constant 0 : index
    %c0_7 = arith.constant 0 : index
    %10 = vector.load %arg8[%c0_5, %c0_6, %c0_7] : memref<1x8x128xf32, #tpu.memory_space<vmem>>, vector<1x8x128xf32>
    tpu.vector_store %arg8[%c0_5, %c0_6, %c0_7], %9 {strides = array<i32>} : memref<1x8x128xf32, #tpu.memory_space<vmem>>, vector<1x8x128xf32>,
    %c0_i32_8 = arith.constant 0 : i32
    %11 = arith.cmpi eq, %arg0, %c0_i32_8 : i32
    %12 = arith.extui %11 : i1 to i32
    %c0_i32_9 = arith.constant 0 : i32
    %13 = arith.cmpi ne, %12, %c0_i32_9 : i32
    scf.if %13 {
      %c0_10 = arith.constant 0 : index
      %c0_11 = arith.constant 0 : index
      %14 = vector.load %arg1[%c0_10, %c0_11] : memref<1x128xf32, #tpu.memory_space<vmem>>, vector<1x128xf32>
      %c0_12 = arith.constant 0 : index
      %c0_13 = arith.constant 0 : index
      %15 = vector.load %arg2[%c0_12, %c0_13] : memref<1x128xf32, #tpu.memory_space<vmem>>, vector<1x128xf32>
      %16 = arith.subf %14, %15 : vector<1x128xf32>
      %17 = arith.mulf %16, %16 : vector<1x128xf32>
      %18 = vector.shape_cast %17 : vector<1x128xf32> to vector<1x1x128xf32>
      %cst_14 = arith.constant dense<0.000000e+00> : vector<1xf32>
      %19 = vector.multi_reduction <add>, %18, %cst_14 [1, 2] : vector<1x1x128xf32> to vector<1xf32>
      %20 = vector.shape_cast %19 : vector<1xf32> to vector<1x1x1xf32>
      %21 = vector.extract %20[0, 0, 0] : f32 from vector<1x1x1xf32>
      %c0_15 = arith.constant 0 : index
      %c0_16 = arith.constant 0 : index
      %22 = vector.load %arg3[%c0_15, %c0_16] : memref<1x128xf32, #tpu.memory_space<vmem>>, vector<1x128xf32>
      %c0_17 = arith.constant 0 : index
      %c0_18 = arith.constant 0 : index
      %23 = vector.load %arg4[%c0_17, %c0_18] : memref<1x128xf32, #tpu.memory_space<vmem>>, vector<1x128xf32>
      %24 = arith.subf %22, %23 : vector<1x128xf32>
      %25 = arith.mulf %24, %24 : vector<1x128xf32>
      %26 = vector.shape_cast %25 : vector<1x128xf32> to vector<1x1x128xf32>
      %cst_19 = arith.constant dense<0.000000e+00> : vector<1xf32>
      %27 = vector.multi_reduction <add>, %26, %cst_19 [1, 2] : vector<1x1x128xf32> to vector<1xf32>
      %28 = vector.shape_cast %27 : vector<1xf32> to vector<1x1x1xf32>
      %29 = vector.extract %28[0, 0, 0] : f32 from vector<1x1x1xf32>
      %30 = arith.addf %21, %29 : f32
      %c0_20 = arith.constant 0 : index
      %c0_21 = arith.constant 0 : index
      %c0_22 = arith.constant 0 : index
      %31 = vector.load %arg8[%c0_20, %c0_21, %c0_22] : memref<1x8x128xf32, #tpu.memory_space<vmem>>, vector<1x8x128xf32>
      %32 = vector.broadcast %30 : f32 to vector<1x8x128xf32>
      %33 = arith.addf %31, %32 : vector<1x8x128xf32>
      %c0_23 = arith.constant 0 : index
      %c0_24 = arith.constant 0 : index
      %c0_25 = arith.constant 0 : index
      %34 = vector.load %arg8[%c0_23, %c0_24, %c0_25] : memref<1x8x128xf32, #tpu.memory_space<vmem>>, vector<1x8x128xf32>
      tpu.vector_store %arg8[%c0_23, %c0_24, %c0_25], %33 {strides = array<i32>} : memref<1x8x128xf32, #tpu.memory_space<vmem>>, vector<1x8x128xf32>,
    } else {
    }
    return
  }
  func.func @transform_0(%arg0: i32) -> (i32, i32) {
    %c0_i32 = arith.constant 0 : i32
    %c0_i32_0 = arith.constant 0 : i32
    %c0_i32_1 = arith.constant 0 : i32
    return %c0_i32, %c0_i32_0 : i32, i32
  }
  func.func @transform_1(%arg0: i32) -> (i32, i32) {
    %c0_i32 = arith.constant 0 : i32
    %c0_i32_0 = arith.constant 0 : i32
    %c0_i32_1 = arith.constant 0 : i32
    return %c0_i32, %c0_i32_0 : i32, i32
  }
  func.func @transform_2(%arg0: i32) -> (i32, i32) {
    %c0_i32 = arith.constant 0 : i32
    %c0_i32_0 = arith.constant 0 : i32
    %c0_i32_1 = arith.constant 0 : i32
    return %c0_i32, %c0_i32_0 : i32, i32
  }
  func.func @transform_3(%arg0: i32) -> (i32, i32) {
    %c0_i32 = arith.constant 0 : i32
    %c0_i32_0 = arith.constant 0 : i32
    %c0_i32_1 = arith.constant 0 : i32
    return %c0_i32, %c0_i32_0 : i32, i32
  }
  func.func @transform_4(%arg0: i32) -> (i32, i32) {
    %c0_i32 = arith.constant 0 : i32
    %c0_i32_0 = arith.constant 0 : i32
    %c0_i32_1 = arith.constant 0 : i32
    return %c0_i32, %c0_i32_0 : i32, i32
  }
  func.func @transform_5(%arg0: i32) -> (i32, i32, i32) {
    %c0_i32 = arith.constant 0 : i32
    %c0_i32_0 = arith.constant 0 : i32
    %c0_i32_1 = arith.constant 0 : i32
    return %arg0, %c0_i32, %c0_i32_0 : i32, i32, i32
  }
  func.func @transform_6(%arg0: i32) -> (i32, i32) {
    %c0_i32 = arith.constant 0 : i32
    %c0_i32_0 = arith.constant 0 : i32
    return %arg0, %c0_i32 : i32, i32
  }
  func.func @transform_7(%arg0: i32) -> (i32, i32, i32) {
    %c0_i32 = arith.constant 0 : i32
    %c0_i32_0 = arith.constant 0 : i32
    %c0_i32_1 = arith.constant 0 : i32
    return %arg0, %c0_i32, %c0_i32_0 : i32, i32, i32
  }
}

</mosaic_0001>

<bundles_post_ra>
// kernel: tpu_custom_call.1
= control target key start
LH: loop header
LB: loop body
LE: loop exit
PB: predicated region body
PF: predicated region fallthrough
CT: control target
= control target key end

     0   :  { %12 = vsyncpa [#allocation3], 0  ;;  %s554_s0 = inlined_call_operand.hbm [shape: f32[1,128], index: 0, kind: input, shape index: {}]   ;;  %s555_s1 = inlined_call_operand.vmem [shape: f32[1,128], index: 1, kind: input, shape index: {}]   ;;  %s556_s2 = inlined_call_operand.hbm [shape: f32[1,128], index: 2, kind: input, shape index: {}]   ;;  %s557_s3 = inlined_call_operand.hbm [shape: f32[1,128], index: 3, kind: input, shape index: {}]   ;;  %s558_s4 = inlined_call_operand.vmem [shape: f32[4,32], index: 4, kind: input, shape index: {}]   ;;  %s559_s5 = inlined_call_operand.hbm [shape: f32[3,4,32], index: 5, kind: input, shape index: {}]   ;;  %s560_s6 = inlined_call_operand.vmem [shape: f32[3,32], index: 6, kind: input, shape index: {}]   ;;  %s561_s7 = inlined_call_operand.hbm [shape: f32[1,8,128], index: 7, kind: output, shape index: {}]  }
   0x1   :  { %13 = vsyncpa [#allocation6], 0 }
   0x2   :  { %14 = vsyncpa [#allocation9], 0 }
   0x3   :  { %15 = vsyncpa [#allocation4], 0  ;;  %s427_s24 = smov [#allocation5]   ;;  %s428_s26 = smov [#allocation2]  }
   0x4   :  { %s34_s25 = sshll.u32 %s427_s24, 4  ;;  %s22_s27 = sshll.u32 %s428_s26, 4  ;;  %s35_s25 = int_to_ptr.vmem [resolvable:$true] %s34_s25  ;;  %s23_s27 = int_to_ptr.vmem [resolvable:$true] %s22_s27 }
   0x5   :  { %s311_s28 = scalar_lea.vmem %s35_s25, 16  ;;  %s315_s29 = scalar_lea.vmem %s35_s25, 32 }
   0x6   :  { %p312_p0 = scmp.ne.s32.totalorder %s35_s25, %s311_s28  ;;  %p316_p1 = scmp.lt.s32.totalorder %s35_s25, %s35_s25 }
   0x7   :  { %p317_p2 = scmp.lt.s32.totalorder %s315_s29, %s311_s28 }
   0x9   :  { %p318_p3 = por %p317_p2, %p316_p1 }
   0xb   :  { %p319_p4 = pnand %p318_p3, %p312_p0 }
   0xd   :  { %322 = shalt.err (!%p319_p4)
}
   0xe   :  { %37 = dma.hbm_to_vmem [thread:$0]  %s556_s2, 16, %s35_s25, [#allocation6]  }
   0xf   :  { %s331_s9 = scalar_lea.vmem %s23_s27, 16  ;;  %s335_s10 = scalar_lea.vmem %s23_s27, 32 }
  0x10   :  { %p332_p5 = scmp.ne.s32.totalorder %s23_s27, %s331_s9  ;;  %p336_p6 = scmp.lt.s32.totalorder %s23_s27, %s23_s27 }
  0x11   :  { %p337_p7 = scmp.lt.s32.totalorder %s335_s10, %s331_s9 }
  0x13   :  { %p338_p8 = por %p337_p7, %p336_p6 }
  0x15   :  { %p339_p9 = pnand %p338_p8, %p332_p5 }
  0x17   :  { %342 = shalt.err (!%p339_p9)
}
  0x18   :  { %25 = dma.hbm_to_vmem [thread:$0]  %s554_s0, 16, %s23_s27, [#allocation3]  }
  0x19   :  { %s429_s13 = smov [#allocation7]   ;;  %s430_s15 = smov [#allocation8]  }
  0x1a   :  { %s44_s14 = sshll.u32 %s429_s13, 4  ;;  %s55_s16 = sshll.u32 %s430_s15, 4  ;;  %s45_s14 = int_to_ptr.vmem [resolvable:$true] %s44_s14  ;;  %s56_s16 = int_to_ptr.vmem [resolvable:$true] %s55_s16 }
  0x1b   :  { %s351_s17 = scalar_lea.vmem %s45_s14, 16  ;;  %s355_s2 = scalar_lea.vmem %s45_s14, 32 }
  0x1c   :  { %p352_p10 = scmp.ne.s32.totalorder %s45_s14, %s351_s17  ;;  %p356_p11 = scmp.lt.s32.totalorder %s45_s14, %s45_s14 }
  0x1d   :  { %p357_p12 = scmp.lt.s32.totalorder %s355_s2, %s351_s17 }
  0x1f   :  { %p358_p13 = por %p357_p12, %p356_p11 }
  0x21   :  { %p359_p0 = pnand %p358_p13, %p352_p10 }
  0x23   :  { %362 = shalt.err (!%p359_p0)
}
  0x24   :  { %47 = dma.hbm_to_vmem [thread:$0]  %s557_s3, 16, %s45_s14, [#allocation6]  }
  0x25   :  { %s371_s20 = scalar_lea.vmem %s56_s16, 192  ;;  %p376_p2 = scmp.lt.s32.totalorder %s56_s16, %s56_s16 }
  0x26   :  { %p372_p1 = scmp.ne.s32.totalorder %s56_s16, %s371_s20  ;;  %p377_p3 = scmp.lt.s32.totalorder %s371_s20, %s371_s20 }
  0x28   :  { %p378_p4 = por %p377_p3, %p376_p2 }
  0x2a   :  { %p379_p5 = pnand %p378_p4, %p372_p1 }
  0x2c   :  { %382 = shalt.err (!%p379_p5)
}
  0x2d   :  { %s431_s0 = smov 64   ;;  %s432_s21 = smov 4  }
  0x2e   :  { %61 = dma.hbm_to_vmem [thread:$0]  %s559_s5, 192, %s56_s16, [#allocation9], %s431_s0, %s431_s0, %s432_s21  }
  0x2f   :  { %411 = dma.done.wait [#allocation3], 16  }
  0x30   :  { %412 = vsyncadd [#allocation3], 4294967280 }
  0x31   :  { %413 = dma.done.wait [#allocation6], 32  }
  0x32   :  { %414 = vsyncadd [#allocation6], 4294967264 }
  0x33   :  { %415 = dma.done.wait [#allocation9], 192  }
  0x34   :  { %416 = vsyncadd [#allocation9], 4294967104  ;;  %v489_v0 = vld [vmem:[%s558_s4] sm:$0xf]  ;;  %vm79_vm0 = vcmask 257024   ;;  %v83_v3 = vlaneseq  ;;  %s498_s5 = smov 0.0  }
  0x35   :  { %v78_v1 = vmul.f32 %v489_v0, %v489_v0  ;;  %s500_s25 = smov 0  }
  0x36   :  { %v494_v4 = vshrl.u32 %v83_v3, 7 }
  0x37   :  { %v80_v2 = vsel %vm79_vm0, %v78_v1, 0.0 }
  0x38   :  { %81 = vadd.xlane.f32.xlu0 %v80_v2 }
  0xc1   :  { %v496_v5 = vpop.xlane.xlu0 %81 }
  0xc2 LB: > { %v102_v6 = vsub.s32 0, %v494_v4  ;;  %s98_s28 = scalar_lea.vmem %s560_s6, %s425_s25  ;;  %s261_s29 = sshll.u32 %s425_s25, 2  ;;  %vm113_vm1 = vcmask 253952   ;;  %vm132_vm2 = vcmask 3072   ;;  %s425_s25 = sphi %s500_s25, %s90_s25   ;;  %s421_s5 = sphi %s498_s5, %s563_s5  }
  0xc3   : > { %v99_v7 = vld [vmem:[%s98_s28] sm:$0x1]  ;;  %s96_s30 = scalar_lea.vmem [#allocation8], %s261_s29  ;;  %p93_p6 = scmp.lt.s32.totalorder %s425_s25, 2 }
  0xc4   : > { %v112_v8 = vmul.f32 %v99_v7, %v99_v7  ;;  %v97_v9 = vld [vmem:[%s96_s30] sm:$0xf]  ;;  %v103_v10 = vrot.slane %v99_v7, %v102_v6  ;;  %p187_p7 = scmp.lt.s32.totalorder %s425_s25, 3 }
  0xc5   : > { %v108_v11 = vmul.f32 %v97_v9, %v97_v9  ;;  %s519_s8 = scalar_select %p93_p6, %s425_s25, 2 }
  0xc6   : > { %v114_v12 = vsel %vm113_vm1, %v112_v8, 0.0  ;;  %v104_v13 = vmul.f32 %v103_v10, %v97_v9  ;;  %s90_s25 = sadd.s32 1, %s425_s25  }
  0xc7   : > { %115 = vadd.xlane.f32.xlu0 %v114_v12  ;;  %v109_v14 = vsel %vm79_vm0, %v108_v11, 0.0  ;;  %s144_s11 = scalar_lea.vmem %s558_s4, %s519_s8  ;;  %v170_v59 = vstv %s519_s8  ;;  %p87_p8 = scmp.ge.s32.totalorder %s90_s25, 3  }
  0xc8   : > { %v105_v15 = vsel %vm79_vm0, %v104_v13, 0.0  ;;  %v145_v16 = vld [vmem:[%s144_s11] sm:$0x1]  ;;  %vm171_vm3 = vcmp.eq.s32.totalorder %v494_v4, %v170_v59  ;;  %v198_v10 = vld [vmem:[#allocation2] sm:$0x1] (%p87_p8)  ;;  %vm202_vm4 = vcmask (%p87_p8), 1040384  }
  0xc9   : > { %106 = vadd.xlane.f32.xlu1 %v105_v15  ;;  %v154_v17 = vmul.f32 %v145_v16, %v145_v16  ;;  %v149_v33 = vrot.slane %v145_v16, %v102_v6  ;;  %v199_v11 = vld [vmem:[%s555_s1] sm:$0x1] (%p87_p8)  ;;  %v213_v13 = vld [vmem:[#allocation5] sm:$0x1] (%p87_p8)  ;;  %s433_s23 = smov (%p87_p8), [#allocation10]  }
  0xca   :  { %v200_v12 = vsub.f32 (%p87_p8), %v198_v10, %v199_v11  ;;  %s238_s3 = sshll.u32 (%p87_p8), %s433_s23, 4  ;;  %s239_s3 = int_to_ptr.vmem [resolvable:$true] %s238_s3 }
  0xcb   : > { %110 = vadd.xlane.f32.xlu0 %v109_v14  ;;  %v155_v18 = vsel %vm113_vm1, %v154_v17, 0.0  ;;  %v150_v36 = vmul.f32 %v149_v33, %v489_v0  ;;  %v214_v14 = vld [vmem:[#allocation7] sm:$0x1] (%p87_p8)  ;;  %s383_s24 = scalar_lea.vmem (%p87_p8), %s239_s3, 128  ;;  %p388_p10 = scmp.lt.s32.totalorder (%p87_p8), %s239_s3, %s239_s3 }
  0xcc   :  { %v215_v15 = vsub.f32 (%p87_p8), %v213_v13, %v214_v14  ;;  %v201_v16 = vmul.f32 (%p87_p8), %v200_v12, %v200_v12  ;;  %p384_p9 = scmp.ne.s32.totalorder (%p87_p8), %s239_s3, %s383_s24  ;;  %p389_p11 = scmp.lt.s32.totalorder (%p87_p8), %s383_s24, %s383_s24 }
  0xcd   : > { %v151_v38 = vsel %vm79_vm0, %v150_v36, 0.0 }
  0xce   :  { %v216_v17 = vmul.f32 (%p87_p8), %v215_v15, %v215_v15  ;;  %p390_p12 = por (%p87_p8), %p389_p11, %p388_p10 }
  0xcf   : > { %156 = vadd.xlane.f32.xlu0 %v155_v18  ;;  %v203_v18 = vsel (%p87_p8), %vm202_vm4, %v201_v16, 0.0 }
  0xd0   :  { %p391_p13 = pnand (%p87_p8), %p390_p12, %p384_p9 }
 0x150   : > { %v116_v19 = vpop.xlane.xlu0 %115 }
 0x151   : > { %v117_v20 = vrot.slane %v116_v19, 4 }
 0x152   : > { %v107_v30 = vpop.xlane.xlu1 %106 }
 0x153   : > { %v118_v21 = vadd.f32 %v117_v20, %v116_v19  ;;  %v217_v19 = vsel (%p87_p8), %vm202_vm4, %v216_v17, 0.0 }
 0x154   : > { %v111_v26 = vpop.xlane.xlu0 %110 }
 0x155   : > { %v119_v22 = vrot.slane %v118_v21, 2 }
 0x157   : > { %v120_v23 = vadd.f32 %v119_v22, %v118_v21 }
 0x158   : > { %v157_v39 = vpop.xlane.xlu0 %156 }
 0x159   : > { %v121_v24 = vrot.slane %v120_v23, 1  ;;  %v158_v40 = vrot.slane %v157_v39, 4 }
 0x15b   : > { %v122_v25 = vadd.f32 %v121_v24, %v120_v23  ;;  %v159_v41 = vadd.f32 %v158_v40, %v157_v39 }
 0x15d   : > { %264 = vpush %v122_v25  ;;  %v160_v42 = vrot.slane %v159_v41, 2 }
 0x15f   : > { %v161_v46 = vadd.f32 %v160_v42, %v159_v41 }
 0x161   : > { %v162_v49 = vrot.slane %v161_v46, 1 }
 0x163   : > { %v163_v52 = vadd.f32 %v162_v49, %v161_v46 }
 0x18e   : > { %s526_s12 = spop %264 }
 0x18f   : > { %v124_v27 = vstv %s526_s12  ;;  %s129_s15 = smul.f32 -0.25, %s526_s12 }
 0x190   : > { %v125_v28 = vmul.f32 %v124_v27, %v111_v26 }
 0x192   : > { %299 = vrsqrt.f32 %v125_v28 }
 0x19f   : > { %v300_v29 = vpop.eup %299 }
 0x1a0   : > { %v127_v31 = vmin.f32 %v300_v29, 8388608.0 }
 0x1a2   : > { %v128_v32 = vmul.f32 %v127_v31, %v107_v30 }
 0x1a4   : > { %v262_v34 = vadd.f32 -1.0, %v128_v32 }
 0x1a6   : > { %v131_v35 = vmul.f32 %v262_v34, %v262_v34 }
 0x1a8   : > { %v133_v37 = vsel %vm132_vm2, %v131_v35, 0.0 }
 0x1a9   : > { %134 = vadd.xlane.f32.xlu1 %v133_v37 }
 0x1ad   : > { %152 = vadd.xlane.f32.xlu1 %v151_v38 }
 0x232   : > { %v135_v43 = vpop.xlane.xlu1 %134 }
 0x233   : > { %v136_v44 = vrot.slane %v135_v43, 4 }
 0x235   : > { %v137_v45 = vadd.f32 %v136_v44, %v135_v43 }
 0x236   : > { %v153_v56 = vpop.xlane.xlu1 %152 }
 0x237   : > { %v138_v47 = vrot.slane %v137_v45, 2 }
 0x239   : > { %v139_v48 = vadd.f32 %v138_v47, %v137_v45 }
 0x23b   : > { %v140_v50 = vrot.slane %v139_v48, 1 }
 0x23d   : > { %v141_v51 = vadd.f32 %v140_v50, %v139_v48 }
 0x23f   : > { %266 = vpush %v141_v51 }
 0x240   : > { %268 = vpush %v163_v52 }
 0x270   : > { %s267_s13 = spop %266 }
 0x271   : > { %s269_s14 = spop %268  ;;  %s143_s16 = smul.f32 %s267_s13, %s129_s15 }
 0x272   : > { %v165_v53 = vstv %s269_s14  ;;  %s175_s17 = smul.f32 -0.33333334, %s269_s14 }
 0x273   : > { %v166_v54 = vmul.f32 %v165_v53, %v496_v5 }
 0x275   : > { %301 = vrsqrt.f32 %v166_v54 }
 0x282   : > { %v302_v55 = vpop.eup %301 }
 0x283   : > { %v168_v57 = vmin.f32 %v302_v55, 8388608.0 }
 0x285   : > { %v169_v58 = vmul.f32 %v168_v57, %v153_v56 }
 0x287   : > { %v263_v60 = vadd.f32 -1.0, %v169_v58 }
 0x289   : > { %v173_v61 = vmul.f32 %v263_v60, %v263_v60 }
 0x28b   : > { %v174_v62 = vsel %vm171_vm3, 0.0, %v173_v61 }
 0x28c   : > { %v176_v63 = vsel %vm132_vm2, %v174_v62, 0.0 }
 0x28d   : > { %177 = vadd.xlane.f32.xlu0 %v176_v63 }
 0x291   :  { %204 = vadd.xlane.f32.xlu0 (%p87_p8), %v203_v18 }
 0x295   :  { %218 = vadd.xlane.f32.xlu0 (%p87_p8), %v217_v19 }
 0x316   : > { %v178_v1 = vpop.xlane.xlu0 %177 }
 0x317   : > { %v179_v2 = vrot.slane %v178_v1, 4 }
 0x319   : > { %v180_v3 = vadd.f32 %v179_v2, %v178_v1 }
 0x31a   :  { %v205_v20 = vpop.xlane.xlu0 (%p87_p8), %204 }
 0x31b   : > { %v181_v6 = vrot.slane %v180_v3, 2  ;;  %v206_v21 = vrot.slane (%p87_p8), %v205_v20, 4 }
 0x31d   : > { %v182_v7 = vadd.f32 %v181_v6, %v180_v3  ;;  %v207_v22 = vadd.f32 (%p87_p8), %v206_v21, %v205_v20 }
 0x31e   :  { %v219_v0 = vpop.xlane.xlu0 (%p87_p8), %218 }
 0x31f   : > { %v183_v8 = vrot.slane %v182_v7, 1  ;;  %v208_v4 = vrot.slane (%p87_p8), %v207_v22, 2  ;;  %v220_v5 = vrot.slane (%p87_p8), %v219_v0, 4 }
 0x321   : > { %v184_v9 = vadd.f32 %v183_v8, %v182_v7  ;;  %v221_v23 = vadd.f32 (%p87_p8), %v220_v5, %v219_v0  ;;  %v209_v24 = vadd.f32 (%p87_p8), %v208_v4, %v207_v22 }
 0x323   : > { %270 = vpush %v184_v9  ;;  %v222_v25 = vrot.slane (%p87_p8), %v221_v23, 2  ;;  %v210_v26 = vrot.slane (%p87_p8), %v209_v24, 1 }
 0x325   :  { %v223_v27 = vadd.f32 (%p87_p8), %v222_v25, %v221_v23  ;;  %v211_v28 = vadd.f32 (%p87_p8), %v210_v26, %v209_v24 }
 0x327   :  { %272 = vpush (%p87_p8), %v211_v28  ;;  %v224_v29 = vrot.slane (%p87_p8), %v223_v27, 1 }
 0x329   :  { %v225_v30 = vadd.f32 (%p87_p8), %v224_v29, %v223_v27 }
 0x32b   :  { %274 = vpush (%p87_p8), %v225_v30 }
 0x354   : > { %s271_s2 = spop %270 }
 0x355   : > { %s186_s18 = smul.f32 %s271_s2, %s175_s17 }
 0x357   : > { %s188_s19 = sadd.f32 %s186_s18, %s143_s16 }
 0x358   :  { %s273_s4 = spop (%p87_p8), %272 }
 0x359   : > { %s565_s19 = smov (!%p187_p7, %s188_s19), 0.0  ;;  %89 = sbr.rel (!%p87_p8) target bundleno = 194 (0xc2), region = 78 }
 0x35a   : > { %s539_s5 = sadd.f32 %s421_s5, %s565_s19  }
 0x35c   : > { %s562_s20 = smov %s539_s5  ;;  %s275_s6 = spop (%p87_p8), %274 }
 0x35d   : > { %s563_s5 = smov %s562_s20  ;;  %s191_s1 = smul.f32 (%p87_p8), 0.33333334, %s562_s20 }
 0x35e   :  { %s227_s22 = sadd.f32 %s275_s6, %s273_s4 }
 0x35f   :  { %v192_v31 = vstv %s191_s1 }
 0x360   :  { %v229_v32 = vstv %s227_s22 }
 0x361   :  { %v230_v33 = vadd.f32 %v229_v32, %v192_v31 }
 0x363   :  { %231 = vst [vmem:[#allocation10] sm:$0xff] %v230_v33 }
 0x364   :  { %394 = shalt.err (!%p391_p13)
}
 0x365   :  { %241 = dma.vmem_to_hbm [thread:$0]  %s239_s3, 128, %s561_s7, [#allocation4]  }
 0x366   :  { %417 = dma.done.wait [#allocation4], 128  }
 0x367   :  { %418 = vsyncadd [#allocation4], 4294967168 }
 0x368   :  { %245 = vsyncpa [#allocation3], 1 }
 0x369   :  { %246 = vsyncpa [#allocation6], 1 }
 0x36a   :  { %247 = vsyncpa [#allocation9], 1 }
 0x36b   :  { %248 = vsyncpa [#allocation4], 1 }

</bundles_post_ra>
